<compile_context>
chip_gen: v5e
topology: v5e:2x2
jax: 0.10.0
libtpu: 0.0.40
codegen_flags: <defaults>
</compile_context>

<pallas_src>
import jax
import jax.numpy as jnp
from jax.experimental import pallas as pl
from jax.experimental.pallas import tpu as pltpu


def _round_up(x, m):
    return (x + m - 1) // m * m


# --------------------------------------------------------------------------
# Kernel 1 & 3: grid-parallel projection  out = x @ W + b   (f32 accumulate)
# --------------------------------------------------------------------------
def _proj_kernel(x_ref, w_ref, b_ref, o_ref):
    o_ref[...] = (jnp.dot(x_ref[...].astype(w_ref.dtype), w_ref[...],
                          preferred_element_type=jnp.float32)
                  + b_ref[...]).astype(o_ref.dtype)


def matmul_bias(x, w, b, *, tile_n=256):
    """x: (N, Din) f32, w: (Din, Dout) compute dtype, b: (1, Dout) f32 -> (N, Dout) f32."""
    N, Din = x.shape
    Dout = w.shape[1]
    tn = min(tile_n, _round_up(N, 8))
    n_pad = _round_up(N, tn)
    if n_pad != N:
        x = jnp.pad(x, ((0, n_pad - N), (0, 0)))
    out = pl.pallas_call(
        _proj_kernel,
        out_shape=jax.ShapeDtypeStruct((n_pad, Dout), jnp.float32),
        grid_spec=pltpu.PrefetchScalarGridSpec(
            num_scalar_prefetch=0,
            grid=(n_pad // tn,),
            in_specs=[
                pl.BlockSpec((tn, Din), lambda i: (i, 0)),
                pl.BlockSpec((Din, Dout), lambda i: (0, 0)),   # resident weight
                pl.BlockSpec((1, Dout), lambda i: (0, 0)),     # resident bias
            ],
            out_specs=pl.BlockSpec((tn, Dout), lambda i: (i, 0)),
        ),
        compiler_params=pltpu.CompilerParams(
            dimension_semantics=("parallel",)),                # shards across TCs (v7x)
    )(x, w, b)
    return out[:N]


# --------------------------------------------------------------------------
# Kernel 2: sequential LSTM recurrence, Tt timesteps per grid step.
# Only h_prev @ W_hh^T remains inside the time loop.
# --------------------------------------------------------------------------
def _lstm_recurrence_kernel(pg_ref, whh_ref, hs_ref, h_sc, c_sc):
    @pl.when(pl.program_id(0) == 0)
    def _():
        h_sc[...] = jnp.zeros_like(h_sc)
        c_sc[...] = jnp.zeros_like(c_sc)

    hp = h_sc.shape[-1]
    tt = pg_ref.shape[0]

    def step(i, carry):
        h, c = carry
        # gates: (B, 4*Hp), f32.  pre_gates already contains x@W_ih^T + bias.
        gates = pg_ref[i] + jnp.dot(h.astype(whh_ref.dtype), whh_ref[...],
                                    preferred_element_type=jnp.float32)
        # Hp is a multiple of 128 -> lane-aligned gate slices (no XLU shuffles).
        i_g = jax.nn.sigmoid(gates[:, 0 * hp:1 * hp])
        f_g = jax.nn.sigmoid(gates[:, 1 * hp:2 * hp])
        g_g = jnp.tanh(gates[:, 2 * hp:3 * hp])
        o_g = jax.nn.sigmoid(gates[:, 3 * hp:4 * hp])
        c = f_g * c + i_g * g_g
        h = o_g * jnp.tanh(c)
        hs_ref[i] = h.astype(hs_ref.dtype)
        return (h, c)

    h_f, c_f = jax.lax.fori_loop(0, tt, step, (h_sc[...], c_sc[...]), unroll=True)
    h_sc[...] = h_f
    c_sc[...] = c_f


def lstm_recurrence(pre_gates, w_hh_t, *, t_tile=16):
    """pre_gates: (T, B_pad, 4*Hp) f32, w_hh_t: (Hp, 4*Hp). Returns h: (T, B_pad, Hp) f32."""
    T, B, G = pre_gates.shape
    Hp = G // 4
    tt = min(t_tile, T)
    t_pad = _round_up(T, tt)
    if t_pad != T:
        pre_gates = jnp.pad(pre_gates, ((0, t_pad - T), (0, 0), (0, 0)))
    hs = pl.pallas_call(
        _lstm_recurrence_kernel,
        out_shape=jax.ShapeDtypeStruct((t_pad, B, Hp), jnp.float32),
        grid_spec=pltpu.PrefetchScalarGridSpec(
            num_scalar_prefetch=0,
            grid=(t_pad // tt,),
            in_specs=[
                pl.BlockSpec((tt, B, G), lambda c: (c, 0, 0)),   # pre_gates chunk
                # Resident W_hh^T (constant index map).  At production sizes consider
                # single-buffering / bf16 to stay within v7x's 64 MiB VMEM.
                pl.BlockSpec((Hp, G), lambda c: (0, 0)),
            ],
            out_specs=pl.BlockSpec((tt, B, Hp), lambda c: (c, 0, 0)),
            scratch_shapes=[
                pltpu.VMEM((B, Hp), jnp.float32),                # h carry
                pltpu.VMEM((B, Hp), jnp.float32),                # c carry
            ],
        ),
        compiler_params=pltpu.CompilerParams(
            dimension_semantics=("arbitrary",)),                 # sequential recurrence
    )(pre_gates, w_hh_t)
    return hs[:T]


# --------------------------------------------------------------------------
# Parameter preparation: transpose + zero-pad to vreg-friendly shapes.
# --------------------------------------------------------------------------
def prepare_params(raw, compute_dtype=jnp.float32):
    D = raw["w_hh"].shape[1]
    V = raw["w_out"].shape[0]
    Hp = _round_up(D, 128)
    Vp = _round_up(V, 128)

    def pad_gate_weight(w):  # (4D, D) -> (Hp, 4*Hp), transposed, gate blocks at k*Hp
        wp = jnp.zeros((Hp, 4 * Hp), jnp.float32)
        for k in range(4):
            wp = wp.at[:D, k * Hp:k * Hp + D].set(w[k * D:(k + 1) * D, :].T)
        return wp

    b = raw["b_ih"] + raw["b_hh"]
    b_p = jnp.zeros((1, 4 * Hp), jnp.float32)
    for k in range(4):
        b_p = b_p.at[0, k * Hp:k * Hp + D].set(b[k * D:(k + 1) * D])

    w_out_p = jnp.zeros((Hp, Vp), jnp.float32).at[:D, :V].set(raw["w_out"].T)
    b_out_p = jnp.zeros((1, Vp), jnp.float32).at[0, :V].set(raw["b_out"])

    return {
        "w_ih_t": pad_gate_weight(raw["w_ih"]).astype(compute_dtype),   # (Hp, 4Hp)
        "w_hh_t": pad_gate_weight(raw["w_hh"]).astype(compute_dtype),   # (Hp, 4Hp)
        "b_gates": b_p,                                                 # (1, 4Hp) f32
        "w_out_t": w_out_p.astype(compute_dtype),                       # (Hp, Vp)
        "b_out": b_out_p,                                               # (1, Vp) f32
        "d_model": D, "hp": Hp, "vocab_out": V, "vp": Vp,
    }


def lstm_model_apply(raw_params, src, *, compute_dtype=jnp.float32):
    """src: (B, T) int32 token ids. Returns logits (B, T, V) f32, matching the PyTorch module."""
    p = prepare_params(raw_params, compute_dtype)
    B, T = src.shape
    D, Hp, V, Vp = p["d_model"], p["hp"], p["vocab_out"], p["vp"]
    B_pad = _round_up(B, 8)

    # Embedding lookup (XLA glue), pad batch + feature dims, go time-major.
    x = jnp.take(raw_params["embed"], src, axis=0).astype(jnp.float32)   # (B, T, D)
    x = jnp.pad(x, ((0, B_pad - B), (0, 0), (0, Hp - D)))                # (B_pad, T, Hp)
    x_tm = jnp.transpose(x, (1, 0, 2))                                   # (T, B_pad, Hp)

    # 1) Hoisted, time-parallel input projection (+ folded gate bias).
    pre_gates = matmul_bias(x_tm.reshape(T * B_pad, Hp), p["w_ih_t"], p["b_gates"])
    pre_gates = pre_gates.reshape(T, B_pad, 4 * Hp)

    # 2) Sequential recurrence (only h @ W_hh^T inside the time loop).
    hs = lstm_recurrence(pre_gates, p["w_hh_t"])                         # (T, B_pad, Hp)

    # 3) Hoisted, time-parallel vocab projection.
    logits = matmul_bias(hs.reshape(T * B_pad, Hp), p["w_out_t"], p["b_out"])
    logits = logits.reshape(T, B_pad, Vp)
    return jnp.transpose(logits, (1, 0, 2))[:B, :, :V]                   # (B, T, V)


# --------------------------------------------------------------------------
# Pure-JAX reference (lax.scan), mirrors nn.LSTM(batch_first=True) semantics.
# --------------------------------------------------------------------------
def lstm_model_reference(raw, src):
    x = jnp.take(raw["embed"], src, axis=0).astype(jnp.float32)          # (B, T, D)
    B, T, D = x.shape
    w_ih_t, w_hh_t = raw["w_ih"].T, raw["w_hh"].T
    b = raw["b_ih"] + raw["b_hh"]

    def step(carry, x_t):
        h, c = carry
        gates = x_t @ w_ih_t + h @ w_hh_t + b
        i = jax.nn.sigmoid(gates[:, 0 * D:1 * D])
        f = jax.nn.sigmoid(gates[:, 1 * D:2 * D])
        g = jnp.tanh(gates[:, 2 * D:3 * D])
        o = jax.nn.sigmoid(gates[:, 3 * D:4 * D])
        c = f * c + i * g
        h = o * jnp.tanh(c)
        return (h, c), h

    init = (jnp.zeros((B, D), jnp.float32), jnp.zeros((B, D), jnp.float32))
    _, hs = jax.lax.scan(step, init, jnp.transpose(x, (1, 0, 2)))        # (T, B, D)
    hs = jnp.transpose(hs, (1, 0, 2))                                    # (B, T, D)
    return hs @ raw["w_out"].T + raw["b_out"]


def init_params(key, src_vocab, trg_vocab, d_model):
    """PyTorch-shaped parameters (deterministic)."""
    ks = jax.random.split(key, 7)
    scale = 1.0 / jnp.sqrt(jnp.float32(d_model))
    return {
        "embed": jax.random.normal(ks[0], (src_vocab, d_model), jnp.float32),
        "w_ih": jax.random.uniform(ks[1], (4 * d_model, d_model), jnp.float32, -scale, scale),
        "w_hh": jax.random.uniform(ks[2], (4 * d_model, d_model), jnp.float32, -scale, scale),
        "b_ih": jax.random.uniform(ks[3], (4 * d_model,), jnp.float32, -scale, scale),
        "b_hh": jax.random.uniform(ks[4], (4 * d_model,), jnp.float32, -scale, scale),
        "w_out": jax.random.uniform(ks[5], (trg_vocab, d_model), jnp.float32, -scale, scale),
        "b_out": jax.random.uniform(ks[6], (trg_vocab,), jnp.float32, -scale, scale),
    }


if __name__ == "__main__":
    SRC_VOCAB, TRG_VOCAB, D_MODEL = 50, 60, 32
    B, T = 2, 8

    key = jax.random.PRNGKey(0)
    k_param, k_tok = jax.random.split(key)
    raw = init_params(k_param, SRC_VOCAB, TRG_VOCAB, D_MODEL)
    src = jax.random.randint(k_tok, (B, T), 0, SRC_VOCAB, dtype=jnp.int32)

    ref = jax.block_until_ready(lstm_model_reference(raw, src))

    # f32 path: exact semantics of the PyTorch module.
    out = jax.block_until_ready(lstm_model_apply(raw, src, compute_dtype=jnp.float32))
    assert out.shape == (B, T, TRG_VOCAB), out.shape
    err = float(jnp.max(jnp.abs(out - ref)))
    assert jnp.allclose(out, ref, atol=1e-4, rtol=1e-4), err

    # bf16 matmul-operand path (recommended for v6e/v7x MXU throughput); f32 accumulation
    # and f32 h/c keep the drift small — loose tolerance vs the f32 reference.
    out_bf16 = jax.block_until_ready(lstm_model_apply(raw, src, compute_dtype=jnp.bfloat16))
    err_bf = float(jnp.max(jnp.abs(out_bf16 - ref)))
    assert jnp.allclose(out_bf16, ref, atol=1e-1, rtol=1e-1), err_bf

    print("KERNEL_OK")
</pallas_src>

<mosaic_0001>
module attributes {stable_mosaic.version = 11 : i64} {
  func.func @_proj_kernel(%arg0: i32, %arg1: memref<64x128xf32, #tpu.memory_space<vmem>>, %arg2: memref<128x512xf32, #tpu.memory_space<vmem>>, %arg3: memref<1x512xf32, #tpu.memory_space<vmem>>, %arg4: memref<64x512xf32, #tpu.memory_space<vmem>>) attributes {dimension_semantics = [#tpu.dimension_semantics<parallel>], iteration_bounds = array<i64: 1>, scalar_prefetch = 0 : i64, scratch_operands = 0 : i64, tpu.core_type = #tpu.core_type<tc>, window_params = [{transform_indices = @transform_0, window_bounds = array<i64: 64, 128>}, {pipeline_mode = #tpu.pipeline_mode<synchronous>, transform_indices = @transform_1, window_bounds = array<i64: 128, 512>}, {pipeline_mode = #tpu.pipeline_mode<synchronous>, transform_indices = @transform_2, window_bounds = array<i64: 1, 512>}, {transform_indices = @transform_3, window_bounds = array<i64: 64, 512>}]} {
    %c0 = arith.constant 0 : index
    %c0_0 = arith.constant 0 : index
    %0 = vector.load %arg1[%c0, %c0_0] : memref<64x128xf32, #tpu.memory_space<vmem>>, vector<64x128xf32>
    %c0_1 = arith.constant 0 : index
    %c0_2 = arith.constant 0 : index
    %1 = vector.load %arg2[%c0_1, %c0_2] : memref<128x512xf32, #tpu.memory_space<vmem>>, vector<128x512xf32>
    %cst = arith.constant dense<0.000000e+00> : vector<64x512xf32>
    %2 = tpu.matmul %0, %1, %cst {dimension_numbers = #tpu.dot_dimension_numbers<[1], [0], [0], [1], [0, 0, 1, 1], [], []>} : vector<64x128xf32>, vector<128x512xf32>, vector<64x512xf32> -> vector<64x512xf32>
    %c0_3 = arith.constant 0 : index
    %c0_4 = arith.constant 0 : index
    %3 = vector.load %arg3[%c0_3, %c0_4] : memref<1x512xf32, #tpu.memory_space<vmem>>, vector<1x512xf32>
    %4 = vector.broadcast %3 : vector<1x512xf32> to vector<64x512xf32>
    %5 = arith.addf %2, %4 : vector<64x512xf32>
    %c0_5 = arith.constant 0 : index
    %c0_6 = arith.constant 0 : index
    %6 = vector.load %arg4[%c0_5, %c0_6] : memref<64x512xf32, #tpu.memory_space<vmem>>, vector<64x512xf32>
    tpu.vector_store %arg4[%c0_5, %c0_6], %5 {strides = array<i32>} : memref<64x512xf32, #tpu.memory_space<vmem>>, vector<64x512xf32>,
    return
  }
  func.func @transform_0(%arg0: i32) -> (i32, i32) {
    %c0_i32 = arith.constant 0 : i32
    %c0_i32_0 = arith.constant 0 : i32
    return %arg0, %c0_i32 : i32, i32
  }
  func.func @transform_1(%arg0: i32) -> (i32, i32) {
    %c0_i32 = arith.constant 0 : i32
    %c0_i32_0 = arith.constant 0 : i32
    %c0_i32_1 = arith.constant 0 : i32
    return %c0_i32, %c0_i32_0 : i32, i32
  }
  func.func @transform_2(%arg0: i32) -> (i32, i32) {
    %c0_i32 = arith.constant 0 : i32
    %c0_i32_0 = arith.constant 0 : i32
    %c0_i32_1 = arith.constant 0 : i32
    return %c0_i32, %c0_i32_0 : i32, i32
  }
  func.func @transform_3(%arg0: i32) -> (i32, i32) {
    %c0_i32 = arith.constant 0 : i32
    %c0_i32_0 = arith.constant 0 : i32
    return %arg0, %c0_i32 : i32, i32
  }
}

</mosaic_0001>

<bundles_post_ra>
// kernel: tpu_custom_call.1
= control target key start
LH: loop header
LB: loop body
LE: loop exit
PB: predicated region body
PF: predicated region fallthrough
CT: control target
= control target key end

     0   :  { %8 = vsyncpa [#allocation3], 0  ;;  %s554_s0 = inlined_call_operand.hbm [shape: f32[64,128], index: 0, kind: input, shape index: {}]   ;;  %s555_s1 = inlined_call_operand.hbm [shape: f32[128,512], index: 1, kind: input, shape index: {}]   ;;  %s556_s2 = inlined_call_operand.hbm [shape: f32[1,512], index: 2, kind: input, shape index: {}]   ;;  %s557_s3 = inlined_call_operand.hbm [shape: f32[64,512], index: 3, kind: output, shape index: {}]  }
   0x1   :  { %9 = vsyncpa [#allocation6], 0  ;;  %s28_s14 = sshll.u32 %s555_s1, 4  ;;  %s29_s14 = int_to_ptr.hbm [resolvable:$true] %s28_s14 }
   0x2   :  { %10 = vsyncpa [#allocation4], 0  ;;  %s468_s15 = smov [#allocation5]   ;;  %s15_s19 = sshll.u32 %s554_s0, 4  ;;  %s16_s19 = int_to_ptr.hbm [resolvable:$true] %s15_s19 }
   0x3   :  { %s30_s16 = sshll.u32 %s468_s15, 4  ;;  %s469_s20 = smov 512   ;;  %s31_s16 = int_to_ptr.vmem [resolvable:$true] %s30_s16 }
   0x4   :  { %s470_s21 = smov 32   ;;  %s471_s22 = smov [#allocation2]  }
   0x5   :  { %36 = dma.hbm_to_vmem [thread:$0]  %s29_s14, 8192, %s31_s16, [#allocation6], %s469_s20, %s469_s20, %s470_s21  }
   0x6   :  { %s17_s23 = sshll.u32 %s471_s22, 4  ;;  %s472_s1 = smov 128   ;;  %s18_s23 = int_to_ptr.vmem [resolvable:$true] %s17_s23 }
   0x7   :  { %s473_s24 = smov 8   ;;  %s42_s27 = sshll.u32 %s556_s2, 4  ;;  %s43_s27 = int_to_ptr.hbm [resolvable:$true] %s42_s27 }
   0x8   :  { %23 = dma.hbm_to_vmem [thread:$0]  %s16_s19, 1024, %s18_s23, [#allocation3], %s472_s1, %s472_s1, %s473_s24  }
   0x9   :  { %s474_s28 = smov [#allocation7]  }
   0xa   :  { %s44_s0 = sshll.u32 %s474_s28, 4  ;;  %s45_s0 = int_to_ptr.vmem [resolvable:$true] %s44_s0 }
   0xb   :  { %47 = dma.hbm_to_vmem [thread:$0]  %s43_s27, 64, %s45_s0, [#allocation6]  }
   0xc   :  { %462 = dma.done.wait [#allocation3], 1024  }
   0xd   :  { %463 = vsyncadd [#allocation3], 4294966272 }
   0xe   :  { %464 = dma.done.wait [#allocation6], 8256  }
   0xf   :  { %465 = vsyncadd [#allocation6], 4294959040  ;;  %v130_v0 = vld [vmem:[#allocation5 + $0x1f0] sm:$0xff]  ;;  %v131_v1 = vld [vmem:[#allocation5 + $0x1f8] sm:$0xff]  ;;  %s475_s2 = smov [#allocation8]   ;;  %s344_s5 = sshll.u32 %s557_s3, 4  ;;  %s345_s5 = int_to_ptr.hbm [resolvable:$true] %s344_s5 }
  0x10   :  { %v126_v2 = vld [vmem:[#allocation5 + $0x1d0] sm:$0xff]  ;;  %224 = vmatpush.msra.mxu2 %v130_v0  ;;  %265 = vmatpush.msra.mxu3 %v131_v1  ;;  %v127_v3 = vld [vmem:[#allocation5 + $0x1d8] sm:$0xff]  ;;  %v128_v6 = vld [vmem:[#allocation5 + $0x1e0] sm:$0xff]  ;;  %s342_s29 = sshll.u32 %s475_s2, 4  ;;  %s343_s29 = int_to_ptr.vmem [resolvable:$true] %s342_s29 }
  0x11   :  { %v122_v4 = vld [vmem:[#allocation5 + $0x1b0] sm:$0xff]  ;;  %v123_v5 = vld [vmem:[#allocation5 + $0x1b8] sm:$0xff]  ;;  %v129_v7 = vld [vmem:[#allocation5 + $0x1e8] sm:$0xff]  ;;  %142 = vmatpush.msra.mxu0 %v128_v6 }
  0x12   :  { %225 = vmatpush.msra.mxu2 %v126_v2  ;;  %266 = vmatpush.msra.mxu3 %v127_v3  ;;  %v124_v8 = vld [vmem:[#allocation5 + $0x1c0] sm:$0xff]  ;;  %v125_v9 = vld [vmem:[#allocation5 + $0x1c8] sm:$0xff]  ;;  %v118_v10 = vld [vmem:[#allocation5 + $0x190] sm:$0xff] }
  0x13   :  { %183 = vmatpush.msra.mxu1 %v129_v7  ;;  %v119_v11 = vld [vmem:[#allocation5 + $0x198] sm:$0xff]  ;;  %v120_v12 = vld [vmem:[#allocation5 + $0x1a0] sm:$0xff]  ;;  %v121_v13 = vld [vmem:[#allocation5 + $0x1a8] sm:$0xff]  ;;  %143 = vmatpush.msra.mxu0 %v124_v8 }
  0x14   :  { %226 = vmatpush.msra.mxu2 %v122_v4  ;;  %267 = vmatpush.msra.mxu3 %v123_v5  ;;  %v114_v14 = vld [vmem:[#allocation5 + $0x170] sm:$0xff]  ;;  %v115_v15 = vld [vmem:[#allocation5 + $0x178] sm:$0xff]  ;;  %v116_v16 = vld [vmem:[#allocation5 + $0x180] sm:$0xff] }
  0x15   :  { %184 = vmatpush.msra.mxu1 %v125_v9  ;;  %v117_v17 = vld [vmem:[#allocation5 + $0x188] sm:$0xff]  ;;  %144 = vmatpush.msra.mxu0 %v120_v12  ;;  %v110_v18 = vld [vmem:[#allocation5 + $0x150] sm:$0xff]  ;;  %v111_v19 = vld [vmem:[#allocation5 + $0x158] sm:$0xff] }
  0x16   :  { %227 = vmatpush.msra.mxu2 %v118_v10  ;;  %268 = vmatpush.msra.mxu3 %v119_v11  ;;  %v112_v20 = vld [vmem:[#allocation5 + $0x160] sm:$0xff]  ;;  %v113_v21 = vld [vmem:[#allocation5 + $0x168] sm:$0xff]  ;;  %v106_v22 = vld [vmem:[#allocation5 + $0x130] sm:$0xff] }
  0x17   :  { %185 = vmatpush.msra.mxu1 %v121_v13  ;;  %145 = vmatpush.msra.mxu0 %v116_v16  ;;  %v107_v23 = vld [vmem:[#allocation5 + $0x138] sm:$0xff]  ;;  %v108_v24 = vld [vmem:[#allocation5 + $0x140] sm:$0xff]  ;;  %v109_v25 = vld [vmem:[#allocation5 + $0x148] sm:$0xff] }
  0x18   :  { %228 = vmatpush.msra.mxu2 %v114_v14  ;;  %269 = vmatpush.msra.mxu3 %v115_v15  ;;  %v102_v26 = vld [vmem:[#allocation5 + $0x110] sm:$0xff]  ;;  %v103_v27 = vld [vmem:[#allocation5 + $0x118] sm:$0xff]  ;;  %v104_v28 = vld [vmem:[#allocation5 + $0x120] sm:$0xff] }
  0x19   :  { %186 = vmatpush.msra.mxu1 %v117_v17  ;;  %146 = vmatpush.msra.mxu0 %v112_v20  ;;  %v105_v29 = vld [vmem:[#allocation5 + $0x128] sm:$0xff]  ;;  %v98_v30 = vld [vmem:[#allocation5 + $0xf0] sm:$0xff]  ;;  %v99_v31 = vld [vmem:[#allocation5 + $0xf8] sm:$0xff] }
  0x1a   :  { %229 = vmatpush.msra.mxu2 %v110_v18  ;;  %270 = vmatpush.msra.mxu3 %v111_v19  ;;  %v100_v32 = vld [vmem:[#allocation5 + $0x100] sm:$0xff]  ;;  %v101_v33 = vld [vmem:[#allocation5 + $0x108] sm:$0xff]  ;;  %v94_v34 = vld [vmem:[#allocation5 + $0xd0] sm:$0xff] }
  0x1b   :  { %187 = vmatpush.msra.mxu1 %v113_v21  ;;  %147 = vmatpush.msra.mxu0 %v108_v24  ;;  %v95_v35 = vld [vmem:[#allocation5 + $0xd8] sm:$0xff]  ;;  %v96_v36 = vld [vmem:[#allocation5 + $0xe0] sm:$0xff]  ;;  %v97_v37 = vld [vmem:[#allocation5 + $0xe8] sm:$0xff] }
  0x1c   :  { %230 = vmatpush.msra.mxu2 %v106_v22  ;;  %271 = vmatpush.msra.mxu3 %v107_v23  ;;  %v90_v38 = vld [vmem:[#allocation5 + $0xb0] sm:$0xff]  ;;  %v91_v39 = vld [vmem:[#allocation5 + $0xb8] sm:$0xff]  ;;  %v92_v40 = vld [vmem:[#allocation5 + $0xc0] sm:$0xff] }
  0x1d   :  { %188 = vmatpush.msra.mxu1 %v109_v25  ;;  %148 = vmatpush.msra.mxu0 %v104_v28  ;;  %v93_v41 = vld [vmem:[#allocation5 + $0xc8] sm:$0xff]  ;;  %v86_v42 = vld [vmem:[#allocation5 + $0x90] sm:$0xff]  ;;  %v87_v43 = vld [vmem:[#allocation5 + $0x98] sm:$0xff] }
  0x1e   :  { %231 = vmatpush.msra.mxu2 %v102_v26  ;;  %272 = vmatpush.msra.mxu3 %v103_v27  ;;  %v88_v44 = vld [vmem:[#allocation5 + $0xa0] sm:$0xff]  ;;  %v89_v45 = vld [vmem:[#allocation5 + $0xa8] sm:$0xff]  ;;  %v82_v46 = vld [vmem:[#allocation5 + $0x70] sm:$0xff] }
  0x1f   :  { %189 = vmatpush.msra.mxu1 %v105_v29  ;;  %149 = vmatpush.msra.mxu0 %v100_v32  ;;  %v83_v47 = vld [vmem:[#allocation5 + $0x78] sm:$0xff]  ;;  %v84_v48 = vld [vmem:[#allocation5 + $0x80] sm:$0xff]  ;;  %v85_v49 = vld [vmem:[#allocation5 + $0x88] sm:$0xff] }
  0x20   :  { %232 = vmatpush.msra.mxu2 %v98_v30  ;;  %273 = vmatpush.msra.mxu3 %v99_v31  ;;  %v78_v50 = vld [vmem:[#allocation5 + $0x50] sm:$0xff]  ;;  %v79_v51 = vld [vmem:[#allocation5 + $0x58] sm:$0xff]  ;;  %v80_v52 = vld [vmem:[#allocation5 + $0x60] sm:$0xff] }
  0x21   :  { %190 = vmatpush.msra.mxu1 %v101_v33  ;;  %150 = vmatpush.msra.mxu0 %v96_v36  ;;  %v81_v53 = vld [vmem:[#allocation5 + $0x68] sm:$0xff]  ;;  %v74_v54 = vld [vmem:[#allocation5 + $0x30] sm:$0xff]  ;;  %v75_v55 = vld [vmem:[#allocation5 + $0x38] sm:$0xff] }
  0x22   :  { %233 = vmatpush.msra.mxu2 %v94_v34  ;;  %274 = vmatpush.msra.mxu3 %v95_v35  ;;  %v76_v56 = vld [vmem:[#allocation5 + $0x40] sm:$0xff]  ;;  %v77_v57 = vld [vmem:[#allocation5 + $0x48] sm:$0xff]  ;;  %v70_v58 = vld [vmem:[#allocation5 + $0x10] sm:$0xff] }
  0x23   :  { %191 = vmatpush.msra.mxu1 %v97_v37  ;;  %151 = vmatpush.msra.mxu0 %v92_v40  ;;  %v71_v59 = vld [vmem:[#allocation5 + $0x18] sm:$0xff]  ;;  %v60_v60 = vld [vmem:[#allocation2] sm:$0xff]  ;;  %v73_v62 = vld [vmem:[#allocation5 + $0x28] sm:$0xff] }
  0x24   :  { %234 = vmatpush.msra.mxu2 %v90_v38  ;;  %275 = vmatpush.msra.mxu3 %v91_v39  ;;  %v72_v61 = vld [vmem:[#allocation5 + $0x20] sm:$0xff]  ;;  %v69_v0 = vld [vmem:[#allocation5 + $0x8] sm:$0xff]  ;;  %v62_v2 = vld [vmem:[#allocation2 + $0x10] sm:$0xff] }
  0x25   :  { %192 = vmatpush.msra.mxu1 %v93_v41  ;;  %152 = vmatpush.msra.mxu0 %v88_v44  ;;  %v68_v63 = vld [vmem:[#allocation5] sm:$0xff]  ;;  %v61_v1 = vld [vmem:[#allocation2 + $0x8] sm:$0xff]  ;;  %v63_v3 = vld [vmem:[#allocation2 + $0x18] sm:$0xff] }
  0x26   :  { %235 = vmatpush.msra.mxu2 %v86_v42  ;;  %276 = vmatpush.msra.mxu3 %v87_v43  ;;  %v64_v4 = vld [vmem:[#allocation2 + $0x20] sm:$0xff]  ;;  %v65_v5 = vld [vmem:[#allocation2 + $0x28] sm:$0xff]  ;;  %v66_v6 = vld [vmem:[#allocation2 + $0x30] sm:$0xff] }
  0x27   :  { %193 = vmatpush.msra.mxu1 %v89_v45  ;;  %153 = vmatpush.msra.mxu0 %v84_v48  ;;  %v67_v7 = vld [vmem:[#allocation2 + $0x38] sm:$0xff]  ;;  %v132_v8 = vld [vmem:[#allocation7] sm:$0xf] }
  0x28   :  { %236 = vmatpush.msra.mxu2 %v82_v46  ;;  %277 = vmatpush.msra.mxu3 %v83_v47  ;;  %v508_v9 = vperm.slane %v132_v8, 0  ;;  %v510_v10 = vperm.slane %v132_v8, 1  ;;  %v512_v11 = vperm.slane %v132_v8, 2  ;;  %v514_v12 = vperm.slane %v132_v8, 3 }
  0x29   :  { %194 = vmatpush.msra.mxu1 %v85_v49  ;;  %154 = vmatpush.msra.mxu0 %v80_v52 }
  0x2a   :  { %237 = vmatpush.msra.mxu2 %v78_v50  ;;  %278 = vmatpush.msra.mxu3 %v79_v51 }
  0x2b   :  { %195 = vmatpush.msra.mxu1 %v81_v53  ;;  %155 = vmatpush.msra.mxu0 %v76_v56 }
  0x2c   :  { %238 = vmatpush.msra.mxu2 %v74_v54  ;;  %279 = vmatpush.msra.mxu3 %v75_v55 }
  0x2d   :  { %196 = vmatpush.msra.mxu1 %v77_v57  ;;  %156 = vmatpush.msra.mxu0 %v72_v61 }
  0x2e   :  { %239 = vmatpush.msra.mxu2 %v70_v58  ;;  %280 = vmatpush.msra.mxu3 %v71_v59 }
  0x2f   :  { %240 = vmatmul.f32.vlgmr.msra.gmra.mxu2 %v60_v60  ;;  %281 = vmatmul.f32.vlgmr.msra.gmra.mxu3 %v60_v60 }
  0x30   :  { %197 = vmatpush.msra.mxu1 %v73_v62  ;;  %157 = vmatpush.msra.mxu0 %v68_v63 }
  0x31   :  { %158 = vmatmul.f32.vlgmr.msra.gmra.mxu0 %v60_v60 }
  0x32   :  { %198 = vmatpush.msra.mxu1 %v69_v0 }
  0x33   :  { %199 = vmatmul.f32.vlgmr.msra.gmra.mxu1 %v60_v60 }
  0x37   :  { %243 = vmatmul.f32.gmra.mxu2 %v61_v1  ;;  %284 = vmatmul.f32.gmra.mxu3 %v61_v1 }
  0x39   :  { %161 = vmatmul.f32.gmra.mxu0 %v61_v1 }
  0x3b   :  { %202 = vmatmul.f32.gmra.mxu1 %v61_v1 }
  0x3f   :  { %246 = vmatmul.f32.gmra.mxu2 %v62_v2  ;;  %287 = vmatmul.f32.gmra.mxu3 %v62_v2 }
  0x41   :  { %164 = vmatmul.f32.gmra.mxu0 %v62_v2 }
  0x43   :  { %205 = vmatmul.f32.gmra.mxu1 %v62_v2 }
  0x47   :  { %249 = vmatmul.f32.gmra.mxu2 %v63_v3  ;;  %290 = vmatmul.f32.gmra.mxu3 %v63_v3 }
  0x49   :  { %167 = vmatmul.f32.gmra.mxu0 %v63_v3 }
  0x4b   :  { %208 = vmatmul.f32.gmra.mxu1 %v63_v3 }
  0x4f   :  { %252 = vmatmul.f32.gmra.mxu2 %v64_v4  ;;  %293 = vmatmul.f32.gmra.mxu3 %v64_v4 }
  0x51   :  { %170 = vmatmul.f32.gmra.mxu0 %v64_v4 }
  0x53   :  { %211 = vmatmul.f32.gmra.mxu1 %v64_v4 }
  0x57   :  { %255 = vmatmul.f32.gmra.mxu2 %v65_v5  ;;  %296 = vmatmul.f32.gmra.mxu3 %v65_v5 }
  0x59   :  { %173 = vmatmul.f32.gmra.mxu0 %v65_v5 }
  0x5b   :  { %214 = vmatmul.f32.gmra.mxu1 %v65_v5 }
  0x5f   :  { %258 = vmatmul.f32.gmra.mxu2 %v66_v6  ;;  %299 = vmatmul.f32.gmra.mxu3 %v66_v6 }
  0x61   :  { %176 = vmatmul.f32.gmra.mxu0 %v66_v6 }
  0x63   :  { %217 = vmatmul.f32.gmra.mxu1 %v66_v6 }
  0x67   :  { %261 = vmatmul.f32.gmra.mxu2 %v67_v7  ;;  %302 = vmatmul.f32.gmra.mxu3 %v67_v7 }
  0x69   :  { %179 = vmatmul.f32.gmra.mxu0 %v67_v7 }
  0x6b   :  { %220 = vmatmul.f32.gmra.mxu1 %v67_v7 }
  0xae   :  { %v159_v13 = vpop.f32.mrf.mxu0 }
  0xaf   :  { %v160_v15 = vadd.f32 %v159_v13, %v508_v9 }
  0xb0   :  { %v200_v14 = vpop.f32.mrf.mxu1 }
  0xb1   :  { %v201_v16 = vadd.f32 %v200_v14, %v510_v10  ;;  %306 = vst [vmem:[#allocation8] sm:$0xff] %v160_v15 }
  0xb2   :  { %v241_v17 = vpop.f32.mrf.mxu2  ;;  %v282_v18 = vpop.f32.mrf.mxu3 }
  0xb3   :  { %v242_v19 = vadd.f32 %v241_v17, %v512_v11  ;;  %v283_v20 = vadd.f32 %v282_v18, %v514_v12  ;;  %307 = vst [vmem:[#allocation8 + $0x8] sm:$0xff] %v201_v16 }
  0xb5   :  { %308 = vst [vmem:[#allocation8 + $0x10] sm:$0xff] %v242_v19 }
  0xb6   :  { %309 = vst [vmem:[#allocation8 + $0x18] sm:$0xff] %v283_v20  ;;  %v162_v21 = vpop.f32.mrf.mxu0 }
  0xb7   :  { %v163_v23 = vadd.f32 %v162_v21, %v508_v9 }
  0xb8   :  { %v203_v22 = vpop.f32.mrf.mxu1 }
  0xb9   :  { %v204_v24 = vadd.f32 %v203_v22, %v510_v10  ;;  %310 = vst [vmem:[#allocation8 + $0x20] sm:$0xff] %v163_v23 }
  0xba   :  { %v244_v25 = vpop.f32.mrf.mxu2  ;;  %v285_v26 = vpop.f32.mrf.mxu3 }
  0xbb   :  { %v245_v27 = vadd.f32 %v244_v25, %v512_v11  ;;  %v286_v28 = vadd.f32 %v285_v26, %v514_v12  ;;  %311 = vst [vmem:[#allocation8 + $0x28] sm:$0xff] %v204_v24 }
  0xbd   :  { %312 = vst [vmem:[#allocation8 + $0x30] sm:$0xff] %v245_v27 }
  0xbe   :  { %313 = vst [vmem:[#allocation8 + $0x38] sm:$0xff] %v286_v28  ;;  %v165_v29 = vpop.f32.mrf.mxu0 }
  0xbf   :  { %v166_v31 = vadd.f32 %v165_v29, %v508_v9 }
  0xc0   :  { %v206_v30 = vpop.f32.mrf.mxu1 }
  0xc1   :  { %v207_v32 = vadd.f32 %v206_v30, %v510_v10  ;;  %314 = vst [vmem:[#allocation8 + $0x40] sm:$0xff] %v166_v31 }
  0xc2   :  { %v247_v33 = vpop.f32.mrf.mxu2  ;;  %v288_v34 = vpop.f32.mrf.mxu3 }
  0xc3   :  { %v248_v35 = vadd.f32 %v247_v33, %v512_v11  ;;  %v289_v36 = vadd.f32 %v288_v34, %v514_v12  ;;  %315 = vst [vmem:[#allocation8 + $0x48] sm:$0xff] %v207_v32 }
  0xc5   :  { %316 = vst [vmem:[#allocation8 + $0x50] sm:$0xff] %v248_v35 }
  0xc6   :  { %317 = vst [vmem:[#allocation8 + $0x58] sm:$0xff] %v289_v36  ;;  %v168_v37 = vpop.f32.mrf.mxu0 }
  0xc7   :  { %v169_v39 = vadd.f32 %v168_v37, %v508_v9 }
  0xc8   :  { %v209_v38 = vpop.f32.mrf.mxu1 }
  0xc9   :  { %v210_v40 = vadd.f32 %v209_v38, %v510_v10  ;;  %318 = vst [vmem:[#allocation8 + $0x60] sm:$0xff] %v169_v39 }
  0xca   :  { %v250_v41 = vpop.f32.mrf.mxu2  ;;  %v291_v42 = vpop.f32.mrf.mxu3 }
  0xcb   :  { %v251_v43 = vadd.f32 %v250_v41, %v512_v11  ;;  %v292_v44 = vadd.f32 %v291_v42, %v514_v12  ;;  %319 = vst [vmem:[#allocation8 + $0x68] sm:$0xff] %v210_v40 }
  0xcd   :  { %320 = vst [vmem:[#allocation8 + $0x70] sm:$0xff] %v251_v43 }
  0xce   :  { %321 = vst [vmem:[#allocation8 + $0x78] sm:$0xff] %v292_v44  ;;  %v171_v45 = vpop.f32.mrf.mxu0 }
  0xcf   :  { %v172_v47 = vadd.f32 %v171_v45, %v508_v9 }
  0xd0   :  { %v212_v46 = vpop.f32.mrf.mxu1 }
  0xd1   :  { %v213_v48 = vadd.f32 %v212_v46, %v510_v10  ;;  %322 = vst [vmem:[#allocation8 + $0x80] sm:$0xff] %v172_v47 }
  0xd2   :  { %v253_v49 = vpop.f32.mrf.mxu2  ;;  %v294_v50 = vpop.f32.mrf.mxu3 }
  0xd3   :  { %v254_v51 = vadd.f32 %v253_v49, %v512_v11  ;;  %v295_v52 = vadd.f32 %v294_v50, %v514_v12  ;;  %323 = vst [vmem:[#allocation8 + $0x88] sm:$0xff] %v213_v48 }
  0xd5   :  { %324 = vst [vmem:[#allocation8 + $0x90] sm:$0xff] %v254_v51 }
  0xd6   :  { %325 = vst [vmem:[#allocation8 + $0x98] sm:$0xff] %v295_v52  ;;  %v174_v53 = vpop.f32.mrf.mxu0 }
  0xd7   :  { %v175_v55 = vadd.f32 %v174_v53, %v508_v9 }
  0xd8   :  { %v215_v54 = vpop.f32.mrf.mxu1 }
  0xd9   :  { %v216_v56 = vadd.f32 %v215_v54, %v510_v10  ;;  %326 = vst [vmem:[#allocation8 + $0xa0] sm:$0xff] %v175_v55 }
  0xda   :  { %v256_v57 = vpop.f32.mrf.mxu2  ;;  %v297_v58 = vpop.f32.mrf.mxu3 }
  0xdb   :  { %v257_v59 = vadd.f32 %v256_v57, %v512_v11  ;;  %v298_v60 = vadd.f32 %v297_v58, %v514_v12  ;;  %327 = vst [vmem:[#allocation8 + $0xa8] sm:$0xff] %v216_v56 }
  0xdd   :  { %328 = vst [vmem:[#allocation8 + $0xb0] sm:$0xff] %v257_v59 }
  0xde   :  { %329 = vst [vmem:[#allocation8 + $0xb8] sm:$0xff] %v298_v60  ;;  %v177_v61 = vpop.f32.mrf.mxu0 }
  0xdf   :  { %v178_v63 = vadd.f32 %v177_v61, %v508_v9 }
  0xe0   :  { %v218_v62 = vpop.f32.mrf.mxu1 }
  0xe1   :  { %v219_v0 = vadd.f32 %v218_v62, %v510_v10  ;;  %330 = vst [vmem:[#allocation8 + $0xc0] sm:$0xff] %v178_v63 }
  0xe2   :  { %v259_v1 = vpop.f32.mrf.mxu2  ;;  %v300_v2 = vpop.f32.mrf.mxu3 }
  0xe3   :  { %v260_v3 = vadd.f32 %v259_v1, %v512_v11  ;;  %v301_v4 = vadd.f32 %v300_v2, %v514_v12  ;;  %331 = vst [vmem:[#allocation8 + $0xc8] sm:$0xff] %v219_v0 }
  0xe5   :  { %332 = vst [vmem:[#allocation8 + $0xd0] sm:$0xff] %v260_v3 }
  0xe6   :  { %333 = vst [vmem:[#allocation8 + $0xd8] sm:$0xff] %v301_v4  ;;  %v180_v5 = vpop.f32.mrf.mxu0 }
  0xe7   :  { %v181_v7 = vadd.f32 %v180_v5, %v508_v9 }
  0xe8   :  { %v221_v6 = vpop.f32.mrf.mxu1 }
  0xe9   :  { %v222_v8 = vadd.f32 %v221_v6, %v510_v10  ;;  %334 = vst [vmem:[#allocation8 + $0xe0] sm:$0xff] %v181_v7 }
  0xea   :  { %v262_v13 = vpop.f32.mrf.mxu2  ;;  %v303_v14 = vpop.f32.mrf.mxu3 }
  0xeb   :  { %v263_v15 = vadd.f32 %v262_v13, %v512_v11  ;;  %v304_v16 = vadd.f32 %v303_v14, %v514_v12  ;;  %335 = vst [vmem:[#allocation8 + $0xe8] sm:$0xff] %v222_v8 }
  0xed   :  { %336 = vst [vmem:[#allocation8 + $0xf0] sm:$0xff] %v263_v15 }
  0xee   :  { %337 = vst [vmem:[#allocation8 + $0xf8] sm:$0xff] %v304_v16 }
  0xef   :  { %350 = dma.vmem_to_hbm [thread:$0]  %s343_s29, 4096, %s345_s5, [#allocation4], %s469_s20, %s469_s20, %s470_s21  }
  0xf0   :  { %466 = dma.done.wait [#allocation4], 4096  }
  0xf1   :  { %467 = vsyncadd [#allocation4], 4294963200 }
  0xf2   :  { %355 = vsyncpa [#allocation3], 1 }
  0xf3   :  { %356 = vsyncpa [#allocation6], 1 }
  0xf4   :  { %357 = vsyncpa [#allocation4], 1 }

</bundles_post_ra>
